<compile_context>
chip_gen: v5e
topology: v5e:2x2
jax: 0.10.0
libtpu: 0.0.40
codegen_flags: <defaults>
</compile_context>

<pallas_src>
import functools

import jax
import jax.numpy as jnp
from jax.experimental import pallas as pl
from jax.experimental.pallas import tpu as pltpu


def _round_up(v, m):
    return (v + m - 1) // m * m


# ---------------------------------------------------------------------------
# Pallas kernel: per (M-tile, N-tile), masked (x @ W^T + b), sparsity-gated
# ---------------------------------------------------------------------------
def _lsh_linear_kernel(xc_ref, x_ref, wt_ref, b_ref, wc_ref, o_ref,
                       *, num_tables: int):
    # xc_ref: (tm, T)  int32   precomputed token hash codes
    # x_ref : (tm, D)  bf16    token tile
    # wt_ref: (D, tn)  bf16    weight tile (already transposed)
    # b_ref : (1, tn)  f32     bias tile
    # wc_ref: (T, tn)  int32   per-table hash code of each neuron in this tile
    # o_ref : (tm, tn) f32     output tile

    # mask[m, n] = OR_t ( token_code[m, t] == neuron_code[t, n] )
    # T is tiny and static -> unrolled VPU compares; (tm,1)==(1,tn) -> (tm,tn).
    mask = xc_ref[:, 0:1] == wc_ref[0:1, :]
    for t in range(1, num_tables):
        mask = mask | (xc_ref[:, t:t + 1] == wc_ref[t:t + 1, :])

    any_active = jnp.any(mask)

    @pl.when(any_active)
    def _():
        logits = jnp.dot(x_ref[...], wt_ref[...],
                         preferred_element_type=jnp.float32)   # bf16 MXU, f32 acc
        logits = logits + b_ref[...]                           # f32 bias
        o_ref[...] = jnp.where(mask, logits, 0.0).astype(o_ref.dtype)

    @pl.when(jnp.logical_not(any_active))
    def _():
        # Whole tile inactive (or pure padding): skip the MXU, store zeros.
        o_ref[...] = jnp.zeros_like(o_ref)


# ---------------------------------------------------------------------------
# SimHash helpers (plain JAX, f32 — sign decisions must match the reference)
# ---------------------------------------------------------------------------
def compute_token_codes(rows, proj, num_tables, num_hashes):
    """rows: (M, D); proj: (T*H, D) -> (M, T) int32 packed SimHash codes."""
    hx = rows.astype(jnp.float32) @ proj.T.astype(jnp.float32)       # (M, T*H)
    bits = (hx >= 0.0).astype(jnp.int32)
    pows = 2 ** jnp.arange(num_hashes, dtype=jnp.int32)
    codes = jnp.sum(bits.reshape(-1, num_tables, num_hashes) * pows, axis=-1)
    return codes.astype(jnp.int32)


def compute_weight_codes(weight, proj, num_tables, num_hashes):
    """rehash() equivalent: (T, N) int32 per-table code of every neuron."""
    return compute_token_codes(weight, proj, num_tables, num_hashes).T


# ---------------------------------------------------------------------------
# Wrapper
# ---------------------------------------------------------------------------
def lsh_linear_forward(x, weight, bias, proj, wcodes, *, tm=256, tn=512):
    """x: (B,S,D); weight: (N,D); bias: (N,); proj: (T*H,D); wcodes: (T,N) i32."""
    B, S, D = x.shape
    N = weight.shape[0]
    T = wcodes.shape[0]
    TH = proj.shape[0]
    H = TH // T
    M = B * S

    x2 = x.reshape(M, D).astype(jnp.float32)

    # Token hashing hoisted out of the kernel (done once, in f32).
    xcodes = compute_token_codes(x2, proj, T, H)                     # (M, T) i32

    # Tile sizes: clamp to (padded) problem size; keep MXU/lane-friendly multiples.
    tm = max(16, min(tm, _round_up(M, 16)))
    tn = max(128, min(tn, _round_up(N, 128)))
    assert tm % 16 == 0 and tn % 128 == 0
    Mp = _round_up(M, tm)
    Np = _round_up(N, tn)

    # Pad (only if needed) + cast. Padded tokens get code -1, padded neurons
    # code -2 -> never match, so padded tiles are skipped by the kernel gate.
    x_b = x2.astype(jnp.bfloat16)
    xc_p = xcodes
    if Mp != M:
        x_b = jnp.zeros((Mp, D), jnp.bfloat16).at[:M].set(x_b)
        xc_p = jnp.full((Mp, T), -1, jnp.int32).at[:M].set(xcodes)

    wt_b = weight.T.astype(jnp.bfloat16)
    b_p = bias.astype(jnp.float32)[None, :]
    wc_p = wcodes.astype(jnp.int32)
    if Np != N:
        wt_b = jnp.zeros((D, Np), jnp.bfloat16).at[:, :N].set(wt_b)
        b_p = jnp.zeros((1, Np), jnp.float32).at[:, :N].set(b_p)
        wc_p = jnp.full((T, Np), -2, jnp.int32).at[:, :N].set(wc_p)

    kernel = functools.partial(_lsh_linear_kernel, num_tables=T)

    out = pl.pallas_call(
        kernel,
        out_shape=jax.ShapeDtypeStruct((Mp, Np), jnp.float32),
        grid_spec=pltpu.PrefetchScalarGridSpec(
            num_scalar_prefetch=0,
            grid=(Mp // tm, Np // tn),
            in_specs=[
                pl.BlockSpec((tm, T), lambda i, j: (i, 0)),    # token codes
                pl.BlockSpec((tm, D), lambda i, j: (i, 0)),    # x tile (bf16)
                pl.BlockSpec((D, tn), lambda i, j: (0, j)),    # W^T tile (bf16)
                pl.BlockSpec((1, tn), lambda i, j: (0, j)),    # bias tile
                pl.BlockSpec((T, tn), lambda i, j: (0, j)),    # neuron codes
            ],
            out_specs=pl.BlockSpec((tm, tn), lambda i, j: (i, j)),
        ),
        compiler_params=pltpu.CompilerParams(
            dimension_semantics=("parallel", "parallel"),
            vmem_limit_bytes=48 * 1024 * 1024),
    )(xc_p, x_b, wt_b, b_p, wc_p)

    return out[:M, :N].reshape(B, S, N)


# ---------------------------------------------------------------------------
# Pure-JAX reference (f32 math) for verification
# ---------------------------------------------------------------------------
def reference_forward(x, weight, bias, proj, num_tables, num_hashes):
    B, S, D = x.shape
    x2 = x.reshape(-1, D).astype(jnp.float32)
    xcodes = compute_token_codes(x2, proj, num_tables, num_hashes)          # (M, T)
    wcodes = compute_weight_codes(weight, proj, num_tables, num_hashes).T   # (N, T)
    mask = jnp.any(xcodes[:, None, :] == wcodes[None, :, :], axis=-1)       # (M, N)
    logits = x2 @ weight.T.astype(jnp.float32) + bias.astype(jnp.float32)[None, :]
    out = jnp.where(mask, logits, 0.0)
    return out.reshape(B, S, -1)


if __name__ == "__main__":
    # Small, deterministic configuration.
    B, S = 2, 8              # batch, sequence
    INPUT_DIM = 128
    OUTPUT_DIM = 256
    NUM_TABLES = 4
    NUM_HASHES = 4           # 2**4 = 16 buckets per table

    key = jax.random.PRNGKey(0)
    kx, kw, kb, kp = jax.random.split(key, 4)

    x = jax.random.normal(kx, (B, S, INPUT_DIM), dtype=jnp.float32)
    weight = jax.random.normal(kw, (OUTPUT_DIM, INPUT_DIM), dtype=jnp.float32) * 0.05
    bias = jax.random.normal(kb, (OUTPUT_DIM,), dtype=jnp.float32) * 0.05
    proj = jax.random.normal(kp, (NUM_TABLES * NUM_HASHES, INPUT_DIM),
                             dtype=jnp.float32)

    # rehash(): build per-neuron hash codes (the "tables") once.
    wcodes = compute_weight_codes(weight, proj, NUM_TABLES, NUM_HASHES)

    out = lsh_linear_forward(x, weight, bias, proj, wcodes, tm=256, tn=512)
    out = jax.block_until_ready(out)

    ref = reference_forward(x, weight, bias, proj, NUM_TABLES, NUM_HASHES)
    assert out.shape == (B, S, OUTPUT_DIM)
    # Matmul runs in bf16 on the MXU (f32 accumulate) -> loose tolerance vs f32 ref.
    assert jnp.allclose(out, ref, atol=2e-2, rtol=2e-2), "mismatch vs reference"
    # Sparsity pattern must match exactly (mask comes from identical f32 hashing).
    assert jnp.array_equal(out == 0.0, ref == 0.0), "mask mismatch vs reference"

    print("KERNEL_OK")
</pallas_src>

<mosaic_0001>
module attributes {stable_mosaic.version = 11 : i64} {
  func.func @_lsh_linear_kernel(%arg0: i32, %arg1: i32, %arg2: memref<16x4xi32, #tpu.memory_space<vmem>>, %arg3: memref<16x128xbf16, #tpu.memory_space<vmem>>, %arg4: memref<128x256xbf16, #tpu.memory_space<vmem>>, %arg5: memref<1x256xf32, #tpu.memory_space<vmem>>, %arg6: memref<4x256xi32, #tpu.memory_space<vmem>>, %arg7: memref<16x256xf32, #tpu.memory_space<vmem>>) attributes {dimension_semantics = [#tpu.dimension_semantics<parallel>, #tpu.dimension_semantics<parallel>], iteration_bounds = array<i64: 1, 1>, scalar_prefetch = 0 : i64, scratch_operands = 0 : i64, tpu.core_type = #tpu.core_type<tc>, window_params = [{transform_indices = @transform_0, window_bounds = array<i64: 16, 4>}, {transform_indices = @transform_1, window_bounds = array<i64: 16, 128>}, {transform_indices = @transform_2, window_bounds = array<i64: 128, 256>}, {transform_indices = @transform_3, window_bounds = array<i64: 1, 256>}, {transform_indices = @transform_4, window_bounds = array<i64: 4, 256>}, {transform_indices = @transform_5, window_bounds = array<i64: 16, 256>}]} {
    %c0 = arith.constant 0 : index
    %c0_0 = arith.constant 0 : index
    %0 = vector.load %arg2[%c0, %c0_0] : memref<16x4xi32, #tpu.memory_space<vmem>>, vector<16x1xi32>
    %c0_1 = arith.constant 0 : index
    %c0_2 = arith.constant 0 : index
    %1 = vector.load %arg6[%c0_1, %c0_2] : memref<4x256xi32, #tpu.memory_space<vmem>>, vector<1x256xi32>
    %2 = vector.broadcast %0 : vector<16x1xi32> to vector<16x256xi32>
    %3 = vector.broadcast %1 : vector<1x256xi32> to vector<16x256xi32>
    %4 = arith.cmpi eq, %2, %3 : vector<16x256xi32>
    %c0_3 = arith.constant 0 : index
    %c1 = arith.constant 1 : index
    %5 = vector.load %arg2[%c0_3, %c1] : memref<16x4xi32, #tpu.memory_space<vmem>>, vector<16x1xi32>
    %c1_4 = arith.constant 1 : index
    %c0_5 = arith.constant 0 : index
    %6 = vector.load %arg6[%c1_4, %c0_5] : memref<4x256xi32, #tpu.memory_space<vmem>>, vector<1x256xi32>
    %7 = vector.broadcast %5 : vector<16x1xi32> to vector<16x256xi32>
    %8 = vector.broadcast %6 : vector<1x256xi32> to vector<16x256xi32>
    %9 = arith.cmpi eq, %7, %8 : vector<16x256xi32>
    %10 = arith.ori %4, %9 : vector<16x256xi1>
    %c0_6 = arith.constant 0 : index
    %c2 = arith.constant 2 : index
    %11 = vector.load %arg2[%c0_6, %c2] : memref<16x4xi32, #tpu.memory_space<vmem>>, vector<16x1xi32>
    %c2_7 = arith.constant 2 : index
    %c0_8 = arith.constant 0 : index
    %12 = vector.load %arg6[%c2_7, %c0_8] : memref<4x256xi32, #tpu.memory_space<vmem>>, vector<1x256xi32>
    %13 = vector.broadcast %11 : vector<16x1xi32> to vector<16x256xi32>
    %14 = vector.broadcast %12 : vector<1x256xi32> to vector<16x256xi32>
    %15 = arith.cmpi eq, %13, %14 : vector<16x256xi32>
    %16 = arith.ori %10, %15 : vector<16x256xi1>
    %c0_9 = arith.constant 0 : index
    %c3 = arith.constant 3 : index
    %17 = vector.load %arg2[%c0_9, %c3] : memref<16x4xi32, #tpu.memory_space<vmem>>, vector<16x1xi32>
    %c3_10 = arith.constant 3 : index
    %c0_11 = arith.constant 0 : index
    %18 = vector.load %arg6[%c3_10, %c0_11] : memref<4x256xi32, #tpu.memory_space<vmem>>, vector<1x256xi32>
    %19 = vector.broadcast %17 : vector<16x1xi32> to vector<16x256xi32>
    %20 = vector.broadcast %18 : vector<1x256xi32> to vector<16x256xi32>
    %21 = arith.cmpi eq, %19, %20 : vector<16x256xi32>
    %22 = arith.ori %16, %21 : vector<16x256xi1>
    %cst = arith.constant 1.000000e+00 : f32
    %cst_12 = arith.constant 0.000000e+00 : f32
    %23 = vector.broadcast %cst : f32 to vector<16x256xf32>
    %24 = vector.broadcast %cst_12 : f32 to vector<16x256xf32>
    %25 = arith.select %22, %23, %24 : vector<16x256xi1>, vector<16x256xf32>
    %26 = vector.shape_cast %25 : vector<16x256xf32> to vector<1x16x256xf32>
    %cst_13 = arith.constant dense<0xFF800000> : vector<1xf32>
    %27 = vector.multi_reduction <maximumf>, %26, %cst_13 [1, 2] : vector<1x16x256xf32> to vector<1xf32>
    %28 = vector.shape_cast %27 : vector<1xf32> to vector<1x1x1xf32>
    %29 = vector.extract %28[0, 0, 0] : f32 from vector<1x1x1xf32>
    %cst_14 = arith.constant 0.000000e+00 : f32
    %30 = arith.cmpf ogt, %29, %cst_14 : f32
    %31 = arith.extui %30 : i1 to i32
    %c0_i32 = arith.constant 0 : i32
    %32 = arith.cmpi ne, %31, %c0_i32 : i32
    scf.if %32 {
      %c0_16 = arith.constant 0 : index
      %c0_17 = arith.constant 0 : index
      %36 = vector.load %arg3[%c0_16, %c0_17] : memref<16x128xbf16, #tpu.memory_space<vmem>>, vector<16x128xbf16>
      %c0_18 = arith.constant 0 : index
      %c0_19 = arith.constant 0 : index
      %37 = vector.load %arg4[%c0_18, %c0_19] : memref<128x256xbf16, #tpu.memory_space<vmem>>, vector<128x256xbf16>
      %cst_20 = arith.constant dense<0.000000e+00> : vector<16x256xf32>
      %38 = tpu.matmul %36, %37, %cst_20 {dimension_numbers = #tpu.dot_dimension_numbers<[1], [0], [0], [1], [0, 0, 1, 1], [], []>} : vector<16x128xbf16>, vector<128x256xbf16>, vector<16x256xf32> -> vector<16x256xf32>
      %c0_21 = arith.constant 0 : index
      %c0_22 = arith.constant 0 : index
      %39 = vector.load %arg5[%c0_21, %c0_22] : memref<1x256xf32, #tpu.memory_space<vmem>>, vector<1x256xf32>
      %40 = vector.broadcast %39 : vector<1x256xf32> to vector<16x256xf32>
      %41 = arith.addf %38, %40 : vector<16x256xf32>
      %cst_23 = arith.constant 0.000000e+00 : f32
      %42 = vector.broadcast %cst_23 : f32 to vector<16x256xf32>
      %43 = arith.select %22, %41, %42 : vector<16x256xi1>, vector<16x256xf32>
      %c0_24 = arith.constant 0 : index
      %c0_25 = arith.constant 0 : index
      %44 = vector.load %arg7[%c0_24, %c0_25] : memref<16x256xf32, #tpu.memory_space<vmem>>, vector<16x256xf32>
      tpu.vector_store %arg7[%c0_24, %c0_25], %43 {strides = array<i32>} : memref<16x256xf32, #tpu.memory_space<vmem>>, vector<16x256xf32>,
    } else {
    }
    %true = arith.constant true
    %33 = arith.xori %30, %true : i1
    %34 = arith.extui %33 : i1 to i32
    %c0_i32_15 = arith.constant 0 : i32
    %35 = arith.cmpi ne, %34, %c0_i32_15 : i32
    scf.if %35 {
      %cst_16 = arith.constant 0.000000e+00 : f32
      %36 = vector.broadcast %cst_16 : f32 to vector<16x256xf32>
      %c0_17 = arith.constant 0 : index
      %c0_18 = arith.constant 0 : index
      %37 = vector.load %arg7[%c0_17, %c0_18] : memref<16x256xf32, #tpu.memory_space<vmem>>, vector<16x256xf32>
      tpu.vector_store %arg7[%c0_17, %c0_18], %36 {strides = array<i32>} : memref<16x256xf32, #tpu.memory_space<vmem>>, vector<16x256xf32>,
    } else {
    }
    return
  }
  func.func @transform_0(%arg0: i32, %arg1: i32) -> (i32, i32) {
    %c0_i32 = arith.constant 0 : i32
    %c0_i32_0 = arith.constant 0 : i32
    return %arg0, %c0_i32 : i32, i32
  }
  func.func @transform_1(%arg0: i32, %arg1: i32) -> (i32, i32) {
    %c0_i32 = arith.constant 0 : i32
    %c0_i32_0 = arith.constant 0 : i32
    return %arg0, %c0_i32 : i32, i32
  }
  func.func @transform_2(%arg0: i32, %arg1: i32) -> (i32, i32) {
    %c0_i32 = arith.constant 0 : i32
    %c0_i32_0 = arith.constant 0 : i32
    return %c0_i32, %arg1 : i32, i32
  }
  func.func @transform_3(%arg0: i32, %arg1: i32) -> (i32, i32) {
    %c0_i32 = arith.constant 0 : i32
    %c0_i32_0 = arith.constant 0 : i32
    return %c0_i32, %arg1 : i32, i32
  }
  func.func @transform_4(%arg0: i32, %arg1: i32) -> (i32, i32) {
    %c0_i32 = arith.constant 0 : i32
    %c0_i32_0 = arith.constant 0 : i32
    return %c0_i32, %arg1 : i32, i32
  }
  func.func @transform_5(%arg0: i32, %arg1: i32) -> (i32, i32) {
    %c0_i32 = arith.constant 0 : i32
    return %arg0, %arg1 : i32, i32
  }
}

</mosaic_0001>

<bundles_post_ra>
// kernel: tpu_custom_call.1
= control target key start
LH: loop header
LB: loop body
LE: loop exit
PB: predicated region body
PF: predicated region fallthrough
CT: control target
= control target key end

     0   :  { %10 = vsyncpa [#allocation3], 0  ;;  %s666_s0 = inlined_call_operand.vmem [shape: s32[16,4], index: 0, kind: input, shape index: {}]   ;;  %s667_s1 = inlined_call_operand.vmem [shape: bf16[16,128], index: 1, kind: input, shape index: {}]   ;;  %s668_s2 = inlined_call_operand.hbm [shape: bf16[128,256], index: 2, kind: input, shape index: {}]   ;;  %s669_s3 = inlined_call_operand.vmem [shape: f32[1,256], index: 3, kind: input, shape index: {}]   ;;  %s670_s4 = inlined_call_operand.vmem [shape: s32[4,256], index: 4, kind: input, shape index: {}]   ;;  %s671_s5 = inlined_call_operand.hbm [shape: f32[16,256], index: 5, kind: output, shape index: {}]  }
   0x1   :  { %11 = vsyncpa [#allocation4], 0  ;;  %s20_s20 = sshll.u32 %s668_s2, 4  ;;  %s457_s21 = smov [#allocation2]   ;;  %s21_s20 = int_to_ptr.hbm [resolvable:$true] %s20_s20 }
   0x2   :  { %s22_s22 = sshll.u32 %s457_s21, 4  ;;  %s458_s23 = smov 128   ;;  %s23_s22 = int_to_ptr.vmem [resolvable:$true] %s22_s22 }
   0x3   :  { %s459_s24 = smov 8  }
   0x4   :  { %28 = dma.hbm_to_vmem [thread:$0]  %s21_s20, 2048, %s23_s22, [#allocation3], %s458_s23, %s458_s23, %s459_s24  }
   0x5   :  { %453 = dma.done.wait [#allocation3], 2048  }
   0x6   :  { %454 = vsyncadd [#allocation3], 4294965248  ;;  %v460_v0 = vmov 1   ;;  %v461_v1 = vmov 0   ;;  %v462_v2 = vmov 2   ;;  %v37_v3 = vld [vmem:[%s666_s0] sm:$0xff] }
   0x7   :  { %401 = vset.pattern.permute.xlu1 %v460_v0  ;;  %400 = vset.pattern.permute.xlu0 %v461_v1  ;;  %v38_v4 = vld [vmem:[%s666_s0 + $0x8] sm:$0xff]  ;;  %v463_v5 = vmov 3   ;;  %v298_v6 = vld [vmem:[%s670_s4 + $0x1] ss:$4 sm:$0x3]  ;;  %v464_v41 = vmov 0.0  }
   0x8   :  { %402 = vset.pattern.permute.xlu2 %v462_v2  ;;  %55 = vperm.xlu1 %401, %v37_v3   ;;  %v39_v8 = vld [vmem:[%s670_s4] ss:$4 sm:$0x3]  ;;  %v299_v11 = vld [vmem:[%s670_s4 + $0x2] ss:$4 sm:$0x3] }
   0x9   :  { %41 = vperm.xlu0 %400, %v37_v3   ;;  %73 = vperm.xlu2 %402, %v37_v3   ;;  %v60_v12 = vperm.slane %v298_v6, 0  ;;  %v46_v13 = vperm.slane %v39_v8, 0  ;;  %v61_v14 = vperm.slane %v298_v6, 1  ;;  %v47_v15 = vperm.slane %v39_v8, 1 }
   0xa   :  { %v78_v16 = vperm.slane %v299_v11, 0  ;;  %v79_v21 = vperm.slane %v299_v11, 1  ;;  %v300_v27 = vld [vmem:[%s670_s4 + $0x3] ss:$4 sm:$0x3] }
   0xb   :  { %v96_v30 = vperm.slane %v300_v27, 0  ;;  %v97_v31 = vperm.slane %v300_v27, 1 }
  0x10   :  { %58 = vperm.xlu1 %401, %v38_v4  }
  0x11   :  { %44 = vperm.xlu0 %400, %v38_v4   ;;  %76 = vperm.xlu2 %402, %v38_v4  }
  0x18   :  { %404 = vset.pattern.permute.xlu1 %v463_v5 }
  0x19   :  { %403 = vset.pattern.permute.xlu0 %v463_v5  ;;  %94 = vperm.xlu1 %404, %v38_v4  }
  0x1a   :  { %91 = vperm.xlu0 %403, %v37_v3  }
  0x63   :  { %v74_v10 = vpop.permute.xlu2 %73 }
  0x64   :  { %vm80_vm4 = vcmp.eq.s32.totalorder %v74_v10, %v78_v16  ;;  %vm81_vm11 = vcmp.eq.s32.totalorder %v74_v10, %v79_v21 }
  0x6b   :  { %v77_v24 = vpop.permute.xlu2 %76 }
  0x6c   :  { %vm82_vm13 = vcmp.eq.s32.totalorder %v77_v24, %v78_v16  ;;  %vm83_vm15 = vcmp.eq.s32.totalorder %v77_v24, %v79_v21 }
  0x7a   :  { %v56_v7 = vpop.permute.xlu1 %55 }
  0x7b   :  { %v42_v9 = vpop.permute.xlu0 %41  ;;  %vm517_vm0 = vcmp.eq.s32.totalorder %v56_v7, %v60_v12  ;;  %vm525_vm2 = vcmp.eq.s32.totalorder %v56_v7, %v61_v14 }
  0x7c   :  { %vm521_vm1 = vcmp.eq.s32.totalorder %v42_v9, %v46_v13  ;;  %vm529_vm3 = vcmp.eq.s32.totalorder %v42_v9, %v47_v15 }
  0x7d   :  { %vm66_vm5 = vmor %vm521_vm1, %vm517_vm0 }
  0x7e   :  { %vm67_vm8 = vmor %vm529_vm3, %vm525_vm2 }
  0x7f   :  { %vm556_vm12 = vmor %vm66_vm5, %vm80_vm4 }
  0x80   :  { %vm566_vm1 = vmor %vm67_vm8, %vm81_vm11 }
  0x82   :  { %v59_v19 = vpop.permute.xlu1 %58 }
  0x83   :  { %v45_v20 = vpop.permute.xlu0 %44  ;;  %vm537_vm6 = vcmp.eq.s32.totalorder %v59_v19, %v60_v12  ;;  %vm552_vm9 = vcmp.eq.s32.totalorder %v59_v19, %v61_v14 }
  0x84   :  { %vm541_vm7 = vcmp.eq.s32.totalorder %v45_v20, %v46_v13  ;;  %vm51_vm10 = vcmp.eq.s32.totalorder %v45_v20, %v47_v15 }
  0x85   :  { %vm68_vm14 = vmor %vm541_vm7, %vm537_vm6 }
  0x86   :  { %vm69_vm0 = vmor %vm51_vm10, %vm552_vm9 }
  0x87   :  { %vm570_vm2 = vmor %vm68_vm14, %vm82_vm13 }
  0x88   :  { %vm574_vm3 = vmor %vm69_vm0, %vm83_vm15 }
  0x8b   :  { %v95_v33 = vpop.permute.xlu1 %94 }
  0x8c   :  { %v92_v35 = vpop.permute.xlu0 %91  ;;  %vm578_vm4 = vcmp.eq.s32.totalorder %v95_v33, %v96_v30  ;;  %vm582_vm5 = vcmp.eq.s32.totalorder %v95_v33, %v97_v31 }
  0x8d   :  { %vm586_vm6 = vcmp.eq.s32.totalorder %v92_v35, %v96_v30  ;;  %vm104_vm7 = vmor %vm570_vm2, %vm578_vm4  ;;  %vm594_vm8 = vcmp.eq.s32.totalorder %v92_v35, %v97_v31 }
  0x8e   :  { %vm105_vm9 = vmor %vm574_vm3, %vm582_vm5  ;;  %v108_v42 = vsel %vm104_vm7, 1.0, %v464_v41 }
  0x8f   :  { %v109_v43 = vsel %vm105_vm9, 1.0, %v464_v41  ;;  %vm102_vm10 = vmor %vm556_vm12, %vm586_vm6 }
  0x90   :  { %vm103_vm11 = vmor %vm566_vm1, %vm594_vm8  ;;  %v106_v44 = vsel %vm102_vm10, 1.0, %v464_v41  ;;  %v111_v45 = vmax.f32 %v108_v42, %v109_v43 }
  0x91   :  { %v107_v46 = vsel %vm103_vm11, 1.0, %v464_v41 }
  0x92   :  { %v110_v47 = vmax.f32 %v106_v44, %v107_v46 }
  0x94   :  { %v112_v48 = vmax.f32 %v110_v47, %v111_v45 }
  0x96   :  { %113 = vmax.xlane.f32.xlu2 %v112_v48 }
 0x109   :  { %v114_v49 = vpop.xlane.xlu2 %113 }
 0x10a   :  { %v115_v50 = vrot.slane %v114_v49, 4 }
 0x10c   :  { %v116_v51 = vmax.f32 %v114_v49, %v115_v50 }
 0x10e   :  { %v117_v52 = vrot.slane %v116_v51, 2 }
 0x110   :  { %v118_v53 = vmax.f32 %v116_v51, %v117_v52 }
 0x112   :  { %v119_v54 = vrot.slane %v118_v53, 1 }
 0x114   :  { %v120_v55 = vmax.f32 %v118_v53, %v119_v54 }
 0x116   :  { %386 = vpush %v120_v55 }
 0x147   :  { %s630_s4 = spop %386 }
 0x148   :  { %p122_p0 = scmp.gt.f32.partialorder %s630_s4, 0.0 }
 0x149   :  { %v363_v56 = vld [vmem:[#allocation2 + $0x70] sm:$0xf] (%p122_p0)  ;;  %v385_v57 = vld [vmem:[#allocation2 + $0x74] sm:$0xf0] (%p122_p0)  ;;  %v384_v58 = vld [vmem:[#allocation2 + $0x74] sm:$0xf] (%p122_p0) }
 0x14a   :  { %125 = sbr.rel (!%p122_p0) target bundleno = 502 (0x1f6), region = 29  ;;  %v364_v59 = vor.u32 (%p122_p0), %v385_v57, %v363_v56  ;;  %v365_v60 = vld [vmem:[#allocation2 + $0x78] sm:$0xf0] (%p122_p0)  ;;  %v355_v61 = vld [vmem:[#allocation2 + $0x60] sm:$0xf] (%p122_p0) }
 0x14b   :  { %v383_v62 = vld [vmem:[#allocation2 + $0x64] sm:$0xf0] (%p122_p0)  ;;  %v368_v63 = vor.u32 (%p122_p0), %v384_v58, %v365_v60  ;;  %v382_v0 = vld [vmem:[#allocation2 + $0x64] sm:$0xf] (%p122_p0)  ;;  %v357_v1 = vld [vmem:[#allocation2 + $0x68] sm:$0xf0] (%p122_p0) }
 0x14c   :  { %236 = vmatpush.bf16.msra.mxu0 (%p122_p0), %v364_v59  ;;  %v356_v2 = vor.u32 (%p122_p0), %v383_v62, %v355_v61  ;;  %v360_v3 = vor.u32 (%p122_p0), %v382_v0, %v357_v1  ;;  %v347_v4 = vld [vmem:[#allocation2 + $0x50] sm:$0xf] (%p122_p0)  ;;  %v381_v5 = vld [vmem:[#allocation2 + $0x54] sm:$0xf0] (%p122_p0)  ;;  %v380_v6 = vld [vmem:[#allocation2 + $0x54] sm:$0xf] (%p122_p0) }
 0x14d   :  { %250 = vmatpush.bf16.msra.mxu1 (%p122_p0), %v368_v63  ;;  %v349_v7 = vld [vmem:[#allocation2 + $0x58] sm:$0xf0] (%p122_p0)  ;;  %v348_v8 = vor.u32 (%p122_p0), %v381_v5, %v347_v4  ;;  %v339_v10 = vld [vmem:[#allocation2 + $0x40] sm:$0xf] (%p122_p0)  ;;  %v379_v11 = vld [vmem:[#allocation2 + $0x44] sm:$0xf0] (%p122_p0) }
 0x14e   :  { %v352_v9 = vor.u32 (%p122_p0), %v380_v6, %v349_v7  ;;  %v378_v12 = vld [vmem:[#allocation2 + $0x44] sm:$0xf] (%p122_p0)  ;;  %v341_v13 = vld [vmem:[#allocation2 + $0x48] sm:$0xf0] (%p122_p0)  ;;  %v340_v14 = vor.u32 (%p122_p0), %v379_v11, %v339_v10  ;;  %v331_v16 = vld [vmem:[#allocation2 + $0x30] sm:$0xf] (%p122_p0) }
 0x14f   :  { %v344_v15 = vor.u32 %v378_v12, %v341_v13  ;;  %v377_v17 = vld [vmem:[#allocation2 + $0x34] sm:$0xf0]  ;;  %v376_v18 = vld [vmem:[#allocation2 + $0x34] sm:$0xf]  ;;  %v333_v19 = vld [vmem:[#allocation2 + $0x38] sm:$0xf0] }
 0x150   :  { %237 = vmatpush.bf16.msra.mxu0 %v356_v2  ;;  %v332_v20 = vor.u32 %v377_v17, %v331_v16  ;;  %v336_v21 = vor.u32 %v376_v18, %v333_v19  ;;  %v323_v22 = vld [vmem:[#allocation2 + $0x20] sm:$0xf]  ;;  %v375_v23 = vld [vmem:[#allocation2 + $0x24] sm:$0xf0]  ;;  %v374_v24 = vld [vmem:[#allocation2 + $0x24] sm:$0xf] }
 0x151   :  { %251 = vmatpush.bf16.msra.mxu1 %v360_v3  ;;  %v325_v25 = vld [vmem:[#allocation2 + $0x28] sm:$0xf0]  ;;  %v324_v26 = vor.u32 %v375_v23, %v323_v22  ;;  %v315_v28 = vld [vmem:[#allocation2 + $0x10] sm:$0xf]  ;;  %v373_v30 = vld [vmem:[#allocation2 + $0x14] sm:$0xf0] }
 0x152   :  { %v328_v27 = vor.u32 %v374_v24, %v325_v25  ;;  %v372_v31 = vld [vmem:[#allocation2 + $0x14] sm:$0xf]  ;;  %v317_v33 = vld [vmem:[#allocation2 + $0x18] sm:$0xf0]  ;;  %v316_v35 = vor.u32 %v373_v30, %v315_v28  ;;  %v307_v42 = vld [vmem:[#allocation2] sm:$0xf] }
 0x153   :  { %v320_v41 = vor.u32 %v372_v31, %v317_v33  ;;  %v371_v43 = vld [vmem:[#allocation2 + $0x4] sm:$0xf0]  ;;  %v370_v44 = vld [vmem:[#allocation2 + $0x4] sm:$0xf]  ;;  %v309_v45 = vld [vmem:[#allocation2 + $0x8] sm:$0xf0] }
 0x154   :  { %238 = vmatpush.bf16.msra.mxu0 %v348_v8  ;;  %v308_v46 = vor.u32 %v371_v43, %v307_v42  ;;  %v312_v47 = vor.u32 %v370_v44, %v309_v45  ;;  %v369_v48 = vld [vmem:[%s667_s1] sm:$0xff] }
 0x155   :  { %252 = vmatpush.bf16.msra.mxu1 %v352_v9  ;;  %v144_v49 = vld [vmem:[%s669_s3] sm:$0x3] }
 0x156   :  { %v146_v50 = vperm.slane %v144_v49, 0  ;;  %v147_v51 = vperm.slane %v144_v49, 1 }
 0x158   :  { %239 = vmatpush.bf16.msra.mxu0 %v340_v14 }
 0x159   :  { %253 = vmatpush.bf16.msra.mxu1 %v344_v15 }
 0x15c   :  { %240 = vmatpush.bf16.msra.mxu0 %v332_v20 }
 0x15d   :  { %254 = vmatpush.bf16.msra.mxu1 %v336_v21 }
 0x160   :  { %241 = vmatpush.bf16.msra.mxu0 %v324_v26 }
 0x161   :  { %255 = vmatpush.bf16.msra.mxu1 %v328_v27 }
 0x164   :  { %242 = vmatpush.bf16.msra.mxu0 %v316_v35 }
 0x165   :  { %256 = vmatpush.bf16.msra.mxu1 %v320_v41 }
 0x168   :  { %243 = vmatpush.bf16.msra.mxu0 %v308_v46 }
 0x169   :  { %257 = vmatpush.bf16.msra.mxu1 %v312_v47 }
 0x16b   :  { %244 = vmatmul.bf16.vlgmr.msra.gmra.mxu0 %v369_v48 }
 0x16c   :  { %258 = vmatmul.bf16.vlgmr.msra.gmra.mxu1 %v369_v48 }
 0x1e8   :  { %v245_v52 = vpop.f32.mrf.mxu0 }
 0x1e9   :  { %v246_v53 = vadd.f32 %v245_v52, %v146_v50  ;;  %v259_v54 = vpop.f32.mrf.mxu1 }
 0x1ea   :  { %v260_v55 = vadd.f32 %v259_v54, %v147_v51 }
 0x1eb   :  { %v264_v56 = vsel %vm102_vm10, %v246_v53, 0.0 }
 0x1ec   :  { %268 = vst [vmem:[#allocation5] sm:$0xff] %v264_v56  ;;  %v265_v57 = vsel %vm103_vm11, %v260_v55, 0.0 }
 0x1ed   :  { %269 = vst [vmem:[#allocation5 + $0x8] sm:$0xff] %v265_v57 }
 0x1f0   :  { %v247_v58 = vpop.f32.mrf.mxu0 }
 0x1f1   :  { %v248_v59 = vadd.f32 %v247_v58, %v146_v50  ;;  %v261_v60 = vpop.f32.mrf.mxu1 }
 0x1f2   :  { %v262_v61 = vadd.f32 %v261_v60, %v147_v51 }
 0x1f3   :  { %v266_v29 = vsel %vm104_vm7, %v248_v59, 0.0 }
 0x1f4   :  { %270 = vst [vmem:[#allocation5 + $0x10] sm:$0xff] %v266_v29  ;;  %v267_v32 = vsel %vm105_vm9, %v262_v61, 0.0 }
 0x1f5   :  { %271 = vst [vmem:[#allocation5 + $0x18] sm:$0xff] %v267_v32 }
 0x1f6 PF:  { %274 = sbr.rel (%p122_p0) target bundleno = 512 (0x200), region = 33 }
 0x1fb   :  { %v465_v39 = vmov 0.0  }
 0x1fc   :  { %275 = vst [vmem:[#allocation5] sm:$0xff] %v465_v39 }
 0x1fd   :  { %276 = vst [vmem:[#allocation5 + $0x8] sm:$0xff] %v465_v39 }
 0x1fe   :  { %277 = vst [vmem:[#allocation5 + $0x10] sm:$0xff] %v465_v39 }
 0x1ff   :  { %278 = vst [vmem:[#allocation5 + $0x18] sm:$0xff] %v465_v39 }
 0x200 PF:  { %s285_s14 = sshll.u32 %s671_s5, 4  ;;  %s466_s15 = smov [#allocation5]   ;;  %s286_s14 = int_to_ptr.hbm [resolvable:$true] %s285_s14 }
 0x201   :  { %s283_s16 = sshll.u32 %s466_s15, 4  ;;  %s467_s17 = smov 256   ;;  %s284_s16 = int_to_ptr.vmem [resolvable:$true] %s283_s16 }
 0x202   :  { %s468_s18 = smov 16  }
 0x203   :  { %291 = dma.vmem_to_hbm [thread:$0]  %s284_s16, 512, %s286_s14, [#allocation4], %s467_s17, %s467_s17, %s468_s18  }
 0x204   :  { %455 = dma.done.wait [#allocation4], 512  }
 0x205   :  { %456 = vsyncadd [#allocation4], 4294966784 }
 0x206   :  { %296 = vsyncpa [#allocation3], 1 }
 0x207   :  { %297 = vsyncpa [#allocation4], 1 }

</bundles_post_ra>
